<compile_context>
chip_gen: v7x
topology: tpu7x:2x2x1
jax: 0.10.0
libtpu: 0.0.40
codegen_flags: <defaults>
</compile_context>

<pallas_src>
import math
from functools import partial

import jax
import jax.numpy as jnp
from jax.experimental import pallas as pl
from jax.experimental.pallas import tpu as pltpu

_SQRT_2_OVER_PI = math.sqrt(2.0 / math.pi)
_SUBLANE = 8  # f32 activations stream HBM<->VMEM


def _round_up(n, m):
    return ((n + m - 1) // m) * m


def _gelu_tanh(x):
    # 0.5 * x * (1 + tanh(sqrt(2/pi) * (x + 0.044715 * x^3)))
    # (exactly the module's custom GELU); constants folded, x^3 as x*(x*x).
    x2 = x * x
    inner = _SQRT_2_OVER_PI * x + (_SQRT_2_OVER_PI * 0.044715) * (x * x2)
    return 0.5 * x * (1.0 + jnp.tanh(inner))


def _dnn_kernel(*refs, n_layers: int):
    """Fused MLP forward on one batch tile.

    refs = (x_ref, w0_ref, b0_ref, ..., w{L-1}_ref, b{L-1}_ref, out_ref)
    Matmuls hit the MXU with f32 accumulation; the activation is cast to the
    weight dtype (bf16 fast path) right before each dot.  Bias add + GELU run
    in f32 on the VPU/EUP.
    """
    x_ref = refs[0]
    out_ref = refs[-1]
    param_refs = refs[1:-1]

    h = x_ref[...]
    for layer in range(n_layers):
        w = param_refs[2 * layer][...]
        b = param_refs[2 * layer + 1][...]          # f32, (1, out)
        h = jnp.dot(h.astype(w.dtype), w, preferred_element_type=jnp.float32) + b
        if layer < n_layers - 1:
            h = _gelu_tanh(h)
    # output_activation is None in the reference DNN config -> identity.
    out_ref[...] = h.astype(out_ref.dtype)


def prepare_params(params, compute_dtype=jnp.bfloat16):
    """Cast params once (outside the per-call path).

    params: list of (W, b), W shape (in, out), b shape (1, out) (same math as
    PyTorch x @ W.T + b with W pre-transposed).  Weights go to compute_dtype
    (bf16 by default: native MXU dtype on v5e/v6e/v7x); biases stay f32.
    """
    flat = []
    for w, b in params:
        flat.append(jnp.asarray(w, dtype=compute_dtype))
        flat.append(jnp.asarray(b, dtype=jnp.float32).reshape(1, -1))
    return tuple(flat)


@partial(jax.jit, static_argnames=("tb",))
def dnn_forward(x, flat_params, *, tb: int = 4096):
    """Fused DNN forward.

    x:           (batch, input_dim) float32 — streamed at natural width.
    flat_params: output of prepare_params().
    tb:          max batch tile size (amortizes per-grid-step overhead).
    """
    n_layers = len(flat_params) // 2
    batch, in_dim = x.shape
    out_dim = flat_params[-2].shape[1]

    # Batch tile: large (amortize grid-step overhead), multiple of the f32
    # sublane packing, and capped at ceil(batch/2) so the grid keeps >=2 steps
    # (lets "parallel" semantics use both TensorCores on v7x; no-op elsewhere).
    half = max(_SUBLANE, _round_up(-(-batch // 2), _SUBLANE))
    tile_b = min(_round_up(tb, _SUBLANE), half)
    b_pad = _round_up(batch, tile_b)
    if b_pad != batch:
        x = jnp.pad(x, ((0, b_pad - batch), (0, 0)))

    grid = (b_pad // tile_b,)

    # x: streamed per batch tile at natural lane width.
    in_specs = [pl.BlockSpec((tile_b, in_dim), lambda i: (i, 0))]
    # Weights/biases: constant index_map -> VMEM-resident across grid steps.
    for li in range(n_layers):
        w = flat_params[2 * li]
        b = flat_params[2 * li + 1]
        in_specs.append(pl.BlockSpec(w.shape, lambda i: (0, 0)))
        in_specs.append(pl.BlockSpec(b.shape, lambda i: (0, 0)))
    out_specs = pl.BlockSpec((tile_b, out_dim), lambda i: (i, 0))

    out = pl.pallas_call(
        partial(_dnn_kernel, n_layers=n_layers),
        out_shape=jax.ShapeDtypeStruct((b_pad, out_dim), jnp.float32),
        grid=grid,
        in_specs=in_specs,
        out_specs=out_specs,
        compiler_params=pltpu.CompilerParams(
            dimension_semantics=("parallel",),
            # Natural-width activations: VMEM use is tiny; well under v7x 64MiB.
            vmem_limit_bytes=32 * 1024 * 1024,
        ),
    )(x, *flat_params)

    return out[:batch] if b_pad != batch else out


def init_dnn_params(key, input_dim, hidden_dim, output_dim):
    """Deterministic init mirroring nn.Linear's U(-1/sqrt(fan_in), 1/sqrt(fan_in))."""
    dims = [input_dim] + list(hidden_dim) + [output_dim]
    params = []
    for i in range(len(dims) - 1):
        fan_in, fan_out = dims[i], dims[i + 1]
        key, kw, kb = jax.random.split(key, 3)
        bound = 1.0 / math.sqrt(fan_in)
        w = jax.random.uniform(kw, (fan_in, fan_out), jnp.float32, -bound, bound)
        b = jax.random.uniform(kb, (1, fan_out), jnp.float32, -bound, bound)
        params.append((w, b))
    return params


def dnn_reference(x, params):
    """Pure-JAX reference of the PyTorch forward (tanh-GELU, no output act)."""
    h = x
    for i, (w, b) in enumerate(params):
        h = h @ w + b
        if i < len(params) - 1:
            h = _gelu_tanh(h)
    return h


if __name__ == "__main__":
    # DNN(input_dim=16, hidden_dim=[32, 32], output_dim=8, activation='gelu')
    input_dim, hidden_dim, output_dim = 16, [32, 32], 8

    key = jax.random.PRNGKey(0)
    key, kx = jax.random.split(key)
    params = init_dnn_params(key, input_dim, hidden_dim, output_dim)

    flat_f32 = prepare_params(params, compute_dtype=jnp.float32)
    flat_bf16 = prepare_params(params)  # default bf16 fast path

    # 1) Small batch, f32 weights — exact semantics check (single grid step).
    batch = 8
    x = jax.random.normal(kx, (batch, input_dim), jnp.float32)
    out = jax.block_until_ready(dnn_forward(x, flat_f32))
    ref = dnn_reference(x, params)
    assert out.shape == (batch, output_dim)
    assert jnp.allclose(out, ref, atol=1e-5, rtol=1e-5), "f32 mismatch vs reference"

    # 2) Larger batch, non-multiple of the tile — exercises the batch grid,
    #    padding/slicing, and weights resident across grid steps.
    batch2 = 300
    key, kx2 = jax.random.split(key)
    x2 = jax.random.normal(kx2, (batch2, input_dim), jnp.float32)
    out2 = jax.block_until_ready(dnn_forward(x2, flat_f32, tb=128))
    ref2 = dnn_reference(x2, params)
    assert out2.shape == (batch2, output_dim)
    assert jnp.allclose(out2, ref2, atol=1e-4, rtol=1e-4), "gridded f32 mismatch"

    # 3) Default bf16 weight streaming (all generations), f32 accumulate/GELU.
    out3 = jax.block_until_ready(dnn_forward(x2, flat_bf16))
    assert out3.shape == (batch2, output_dim)
    assert jnp.allclose(out3, ref2, atol=1e-1, rtol=1e-1), "bf16 path mismatch"

    print("KERNEL_OK")
</pallas_src>

<mosaic_0001>
module attributes {stable_mosaic.version = 11 : i64} {
  func.func @_dnn_kernel(%arg0: i32, %arg1: memref<8x16xf32, #tpu.memory_space<vmem>>, %arg2: memref<16x32xf32, #tpu.memory_space<vmem>>, %arg3: memref<1x32xf32, #tpu.memory_space<vmem>>, %arg4: memref<32x32xf32, #tpu.memory_space<vmem>>, %arg5: memref<1x32xf32, #tpu.memory_space<vmem>>, %arg6: memref<32x8xf32, #tpu.memory_space<vmem>>, %arg7: memref<1x8xf32, #tpu.memory_space<vmem>>, %arg8: memref<8x8xf32, #tpu.memory_space<vmem>>) attributes {dimension_semantics = [#tpu.dimension_semantics<parallel>], iteration_bounds = array<i64: 1>, scalar_prefetch = 0 : i64, scratch_operands = 0 : i64, tpu.core_type = #tpu.core_type<tc>, window_params = [{transform_indices = @transform_0, window_bounds = array<i64: 8, 16>}, {pipeline_mode = #tpu.pipeline_mode<synchronous>, transform_indices = @transform_1, window_bounds = array<i64: 16, 32>}, {pipeline_mode = #tpu.pipeline_mode<synchronous>, transform_indices = @transform_2, window_bounds = array<i64: 1, 32>}, {pipeline_mode = #tpu.pipeline_mode<synchronous>, transform_indices = @transform_3, window_bounds = array<i64: 32, 32>}, {pipeline_mode = #tpu.pipeline_mode<synchronous>, transform_indices = @transform_4, window_bounds = array<i64: 1, 32>}, {pipeline_mode = #tpu.pipeline_mode<synchronous>, transform_indices = @transform_5, window_bounds = array<i64: 32, 8>}, {pipeline_mode = #tpu.pipeline_mode<synchronous>, transform_indices = @transform_6, window_bounds = array<i64: 1, 8>}, {transform_indices = @transform_7, window_bounds = array<i64: 8, 8>}]} {
    %c0 = arith.constant 0 : index
    %c0_0 = arith.constant 0 : index
    %0 = vector.load %arg1[%c0, %c0_0] : memref<8x16xf32, #tpu.memory_space<vmem>>, vector<8x16xf32>
    %c0_1 = arith.constant 0 : index
    %c0_2 = arith.constant 0 : index
    %1 = vector.load %arg2[%c0_1, %c0_2] : memref<16x32xf32, #tpu.memory_space<vmem>>, vector<16x32xf32>
    %c0_3 = arith.constant 0 : index
    %c0_4 = arith.constant 0 : index
    %2 = vector.load %arg3[%c0_3, %c0_4] : memref<1x32xf32, #tpu.memory_space<vmem>>, vector<1x32xf32>
    %cst = arith.constant dense<0.000000e+00> : vector<8x32xf32>
    %3 = tpu.matmul %0, %1, %cst {dimension_numbers = #tpu.dot_dimension_numbers<[1], [0], [0], [1], [0, 0, 1, 1], [], []>} : vector<8x16xf32>, vector<16x32xf32>, vector<8x32xf32> -> vector<8x32xf32>
    %4 = vector.broadcast %2 : vector<1x32xf32> to vector<8x32xf32>
    %5 = arith.addf %3, %4 : vector<8x32xf32>
    %6 = arith.mulf %5, %5 : vector<8x32xf32>
    %cst_5 = arith.constant 0.797884583 : f32
    %7 = vector.broadcast %cst_5 : f32 to vector<8x32xf32>
    %8 = arith.mulf %7, %5 : vector<8x32xf32>
    %9 = arith.mulf %5, %6 : vector<8x32xf32>
    %cst_6 = arith.constant 0.0356774069 : f32
    %10 = vector.broadcast %cst_6 : f32 to vector<8x32xf32>
    %11 = arith.mulf %10, %9 : vector<8x32xf32>
    %12 = arith.addf %8, %11 : vector<8x32xf32>
    %cst_7 = arith.constant 5.000000e-01 : f32
    %13 = vector.broadcast %cst_7 : f32 to vector<8x32xf32>
    %14 = arith.mulf %13, %5 : vector<8x32xf32>
    %15 = math.tanh %12 : vector<8x32xf32>
    %cst_8 = arith.constant 1.000000e+00 : f32
    %16 = vector.broadcast %cst_8 : f32 to vector<8x32xf32>
    %17 = arith.addf %16, %15 : vector<8x32xf32>
    %18 = arith.mulf %14, %17 : vector<8x32xf32>
    %c0_9 = arith.constant 0 : index
    %c0_10 = arith.constant 0 : index
    %19 = vector.load %arg4[%c0_9, %c0_10] : memref<32x32xf32, #tpu.memory_space<vmem>>, vector<32x32xf32>
    %c0_11 = arith.constant 0 : index
    %c0_12 = arith.constant 0 : index
    %20 = vector.load %arg5[%c0_11, %c0_12] : memref<1x32xf32, #tpu.memory_space<vmem>>, vector<1x32xf32>
    %cst_13 = arith.constant dense<0.000000e+00> : vector<8x32xf32>
    %21 = tpu.matmul %18, %19, %cst_13 {dimension_numbers = #tpu.dot_dimension_numbers<[1], [0], [0], [1], [0, 0, 1, 1], [], []>} : vector<8x32xf32>, vector<32x32xf32>, vector<8x32xf32> -> vector<8x32xf32>
    %22 = vector.broadcast %20 : vector<1x32xf32> to vector<8x32xf32>
    %23 = arith.addf %21, %22 : vector<8x32xf32>
    %24 = arith.mulf %23, %23 : vector<8x32xf32>
    %cst_14 = arith.constant 0.797884583 : f32
    %25 = vector.broadcast %cst_14 : f32 to vector<8x32xf32>
    %26 = arith.mulf %25, %23 : vector<8x32xf32>
    %27 = arith.mulf %23, %24 : vector<8x32xf32>
    %cst_15 = arith.constant 0.0356774069 : f32
    %28 = vector.broadcast %cst_15 : f32 to vector<8x32xf32>
    %29 = arith.mulf %28, %27 : vector<8x32xf32>
    %30 = arith.addf %26, %29 : vector<8x32xf32>
    %cst_16 = arith.constant 5.000000e-01 : f32
    %31 = vector.broadcast %cst_16 : f32 to vector<8x32xf32>
    %32 = arith.mulf %31, %23 : vector<8x32xf32>
    %33 = math.tanh %30 : vector<8x32xf32>
    %cst_17 = arith.constant 1.000000e+00 : f32
    %34 = vector.broadcast %cst_17 : f32 to vector<8x32xf32>
    %35 = arith.addf %34, %33 : vector<8x32xf32>
    %36 = arith.mulf %32, %35 : vector<8x32xf32>
    %c0_18 = arith.constant 0 : index
    %c0_19 = arith.constant 0 : index
    %37 = vector.load %arg6[%c0_18, %c0_19] : memref<32x8xf32, #tpu.memory_space<vmem>>, vector<32x8xf32>
    %c0_20 = arith.constant 0 : index
    %c0_21 = arith.constant 0 : index
    %38 = vector.load %arg7[%c0_20, %c0_21] : memref<1x8xf32, #tpu.memory_space<vmem>>, vector<1x8xf32>
    %cst_22 = arith.constant dense<0.000000e+00> : vector<8x8xf32>
    %39 = tpu.matmul %36, %37, %cst_22 {dimension_numbers = #tpu.dot_dimension_numbers<[1], [0], [0], [1], [0, 0, 1, 1], [], []>} : vector<8x32xf32>, vector<32x8xf32>, vector<8x8xf32> -> vector<8x8xf32>
    %40 = vector.broadcast %38 : vector<1x8xf32> to vector<8x8xf32>
    %41 = arith.addf %39, %40 : vector<8x8xf32>
    %c0_23 = arith.constant 0 : index
    %c0_24 = arith.constant 0 : index
    %42 = vector.load %arg8[%c0_23, %c0_24] : memref<8x8xf32, #tpu.memory_space<vmem>>, vector<8x8xf32>
    tpu.vector_store %arg8[%c0_23, %c0_24], %41 {strides = array<i32>} : memref<8x8xf32, #tpu.memory_space<vmem>>, vector<8x8xf32>,
    return
  }
  func.func @transform_0(%arg0: i32) -> (i32, i32) {
    %c0_i32 = arith.constant 0 : i32
    %c0_i32_0 = arith.constant 0 : i32
    return %arg0, %c0_i32 : i32, i32
  }
  func.func @transform_1(%arg0: i32) -> (i32, i32) {
    %c0_i32 = arith.constant 0 : i32
    %c0_i32_0 = arith.constant 0 : i32
    %c0_i32_1 = arith.constant 0 : i32
    return %c0_i32, %c0_i32_0 : i32, i32
  }
  func.func @transform_2(%arg0: i32) -> (i32, i32) {
    %c0_i32 = arith.constant 0 : i32
    %c0_i32_0 = arith.constant 0 : i32
    %c0_i32_1 = arith.constant 0 : i32
    return %c0_i32, %c0_i32_0 : i32, i32
  }
  func.func @transform_3(%arg0: i32) -> (i32, i32) {
    %c0_i32 = arith.constant 0 : i32
    %c0_i32_0 = arith.constant 0 : i32
    %c0_i32_1 = arith.constant 0 : i32
    return %c0_i32, %c0_i32_0 : i32, i32
  }
  func.func @transform_4(%arg0: i32) -> (i32, i32) {
    %c0_i32 = arith.constant 0 : i32
    %c0_i32_0 = arith.constant 0 : i32
    %c0_i32_1 = arith.constant 0 : i32
    return %c0_i32, %c0_i32_0 : i32, i32
  }
  func.func @transform_5(%arg0: i32) -> (i32, i32) {
    %c0_i32 = arith.constant 0 : i32
    %c0_i32_0 = arith.constant 0 : i32
    %c0_i32_1 = arith.constant 0 : i32
    return %c0_i32, %c0_i32_0 : i32, i32
  }
  func.func @transform_6(%arg0: i32) -> (i32, i32) {
    %c0_i32 = arith.constant 0 : i32
    %c0_i32_0 = arith.constant 0 : i32
    %c0_i32_1 = arith.constant 0 : i32
    return %c0_i32, %c0_i32_0 : i32, i32
  }
  func.func @transform_7(%arg0: i32) -> (i32, i32) {
    %c0_i32 = arith.constant 0 : i32
    %c0_i32_0 = arith.constant 0 : i32
    return %arg0, %c0_i32 : i32, i32
  }
}

</mosaic_0001>

<bundles_post_ra>
// kernel: dnn_forward.1
= control target key start
LH: loop header
LB: loop body
LE: loop exit
PB: predicated region body
PF: predicated region fallthrough
CT: control target
= control target key end

     0   :  { %12 = vsyncpa [#allocation3], 0  ;;  %s557_s0 = inlined_call_operand.hbm [shape: f32[8,16], index: 0, kind: input, shape index: {}]   ;;  %s558_s1 = inlined_call_operand.vmem [shape: f32[16,32], index: 1, kind: input, shape index: {}]   ;;  %s559_s2 = inlined_call_operand.vmem [shape: f32[1,32], index: 2, kind: input, shape index: {}]   ;;  %s560_s3 = inlined_call_operand.vmem [shape: f32[32,32], index: 3, kind: input, shape index: {}]   ;;  %s561_s4 = inlined_call_operand.vmem [shape: f32[1,32], index: 4, kind: input, shape index: {}]   ;;  %s562_s5 = inlined_call_operand.vmem [shape: f32[32,8], index: 5, kind: input, shape index: {}]   ;;  %s563_s6 = inlined_call_operand.vmem [shape: f32[1,8], index: 6, kind: input, shape index: {}]   ;;  %s564_s7 = inlined_call_operand.hbm [shape: f32[8,8], index: 7, kind: output, shape index: {}]  }
   0x1   :  { %13 = vsyncpa [#allocation4], 0  ;;  %s447_s24 = smov [#allocation2]   ;;  %s399_s28 = scalar_lea.hbm %s557_s0, 128 }
   0x2   :  { %s20_s25 = sshll.u32 %s447_s24, 4  ;;  %p400_p0 = scmp.ne.s32.totalorder %s557_s0, %s399_s28  ;;  %s21_s25 = int_to_ptr.vmem [resolvable:$true] %s20_s25 }
   0x3   :  { %p403_p1 = scmp.lt.u32.totalorder %s399_s28, %s557_s0 }
   0x5   :  { %p405_p2 = pnand %p403_p1, %p400_p0 }
   0x7   :  { %408 = shalt.err (!%p405_p2)
}
   0x8   :  { %s409_s10 = scalar_lea.vmem %s21_s25, 128  ;;  %p414_p4 = scmp.lt.s32.totalorder %s21_s25, %s21_s25 }
   0x9   :  { %p410_p3 = scmp.ne.s32.totalorder %s21_s25, %s409_s10  ;;  %p415_p5 = scmp.lt.s32.totalorder %s409_s10, %s409_s10 }
   0xb   :  { %p416_p6 = por %p415_p5, %p414_p4 }
   0xd   :  { %p417_p7 = pnand %p416_p6, %p410_p3 }
   0xf   :  { %420 = shalt.err (!%p417_p7)
}
  0x10   :  { %23 = dma.hbm_to_vmem [thread:$0]  %s557_s0, 128, %s21_s25, [#allocation3]  }
  0x11   :  { %443 = dma.done.wait [#allocation3], 128  }
  0x12   :  { %444 = vsyncadd [#allocation3], 4294967168  ;;  %v448_v0 = vmov 0.0|0.0   ;;  %vm449_vm0 = vmmov 0   ;;  %v450_v1 = vmov 0.0   ;;  %v40_v2 = vld [vmem:[%s558_s1] sm:$0xff] }
  0x13   :  { %375 = vmatprep.subr.bf16.mxu0 %v448_v0  ;;  %350 = vmatprep.mubr.msk.f32.mxu0 %vm449_vm0, %v450_v1  ;;  %v41_v3 = vld [vmem:[%s558_s1 + $0x8] sm:$0xff]  ;;  %v39_v5 = vld [vmem:[#allocation2] sm:$0xff]  ;;  %vm49_vm1 = vcmask 130048   ;;  %v134_v8 = vld [vmem:[%s560_s3 + $0x10] sm:$0xff]  ;;  %vm143_vm2 = vcmask 261120   ;;  %vm310_vm3 = vcmask 64512  }
  0x14   :  { %378 = vmatprep.subr.bf16.mxu1 %v448_v0  ;;  %361 = vmatprep.mubr.msk.f32.mxu1 %vm449_vm0, %v450_v1  ;;  %v376_v4 = vpack.c.bf16 %v41_v3, %v40_v2  ;;  %v132_v6 = vld [vmem:[%s560_s3] sm:$0xff]  ;;  %v133_v7 = vld [vmem:[%s560_s3 + $0x8] sm:$0xff]  ;;  %v135_v10 = vld [vmem:[%s560_s3 + $0x18] sm:$0xff] }
  0x15   :  { %v379_v9 = vpack.c.bf16 %v133_v7, %v132_v6  ;;  %v382_v11 = vpack.c.bf16 %v135_v10, %v134_v8  ;;  %v327_v12 = vld [vmem:[%s559_s2] ss:$0 sm:$0xff]  ;;  %v227_v26 = vld [vmem:[%s562_s5 + $0x8] sm:$0xff]  ;;  %v228_v28 = vld [vmem:[%s562_s5 + $0x10] sm:$0xff] }
  0x16   :  { %377 = vmatpush3.bf16.msra.mxu0 %v376_v4  ;;  %v226_v25 = vld [vmem:[%s562_s5] sm:$0xff]  ;;  %v229_v29 = vld [vmem:[%s562_s5 + $0x18] sm:$0xff] }
  0x17   :  { %384 = vmatprep.subr.bf16.mxu0 %v448_v0  ;;  %380 = vmatpush3.bf16.msra.mxu1 %v379_v9  ;;  %v385_v27 = vpack.c.bf16 %v227_v26, %v226_v25  ;;  %v388_v30 = vpack.c.bf16 %v229_v29, %v228_v28  ;;  %v329_v31 = vld [vmem:[%s561_s4] ss:$0 sm:$0xff]  ;;  %s451_s4 = smov [#allocation5]  }
  0x18   :  { %381 = vmatprep.subr.bf16.mxu1 %v448_v0  ;;  %v331_v44 = vld [vmem:[%s563_s6] ss:$0 sm:$0xff]  ;;  %s318_s11 = sshll.u32 %s451_s4, 4  ;;  %s319_s11 = int_to_ptr.vmem [resolvable:$true] %s318_s11 }
  0x19   :  { %351 = vmatmul.mubr.msk.f32.vlgmr.msra.gmra.mrb[0].mxu0 %vm49_vm1, %v39_v5  ;;  %s421_s12 = scalar_lea.vmem %s319_s11, 128  ;;  %p426_p9 = scmp.lt.s32.totalorder %s319_s11, %s319_s11 }
  0x1a   :  { %372 = vmatprep.mubr.msk.f32.mxu0 %vm449_vm0, %v450_v1  ;;  %386 = vmatpush3.bf16.msra.mxu0 %v385_v27  ;;  %p422_p8 = scmp.ne.s32.totalorder %s319_s11, %s421_s12  ;;  %p427_p10 = scmp.lt.s32.totalorder %s421_s12, %s421_s12 }
  0x1b   :  { %383 = vmatpush3.bf16.msra.mxu1 %v382_v11  ;;  %387 = vmatprep.subr.bf16.mxu0 %v448_v0 }
  0x1c   :  { %p428_p11 = por %p427_p10, %p426_p9 }
  0x1e   :  { %389 = vmatpush3.bf16.msra.mxu0 %v388_v30  ;;  %p429_p12 = pnand %p428_p11, %p422_p8 }
  0xec   :  { %v119_v13 = vpop.f32.mrb[0].mxu0 }
  0xed   :  { %v120_v14 = vadd.f32 %v327_v12, %v119_v13  ;;  %v352_v15 = vpop.f32.mrb[1].mxu0 }
  0xef   :  { %v123_v16 = vmul.f32 %v120_v14, %v120_v14  ;;  %v124_v18 = vmul.f32 0.7978846, %v120_v14  ;;  %v128_v22 = vmul.f32 0.5, %v120_v14 }
  0xf1   :  { %v125_v17 = vmul.f32 %v123_v16, %v120_v14 }
  0xf3   :  { %v126_v19 = vmul.f32 0.035677407, %v125_v17 }
  0xf5   :  { %v127_v20 = vadd.f32 %v126_v19, %v124_v18 }
  0xf7   :  { %395 = vtanh.f32 %v127_v20 }
 0x101   :  { %v396_v21 = vpop.eup %395 }
 0x102   :  { %v130_v23 = vadd.f32 1.0, %v396_v21 }
 0x104   :  { %v131_v24 = vmul.f32 %v130_v23, %v128_v22 }
 0x106   :  { %362 = vmatmul.mubr.msk.f32.vlgmr.msra.gmra.mrb[0].mxu1 %vm143_vm2, %v131_v24 }
 0x1d9   :  { %v213_v32 = vpop.f32.mrb[0].mxu1 }
 0x1da   :  { %v214_v33 = vadd.f32 %v329_v31, %v213_v32  ;;  %v363_v34 = vpop.f32.mrb[1].mxu1 }
 0x1dc   :  { %v217_v35 = vmul.f32 %v214_v33, %v214_v33  ;;  %v218_v37 = vmul.f32 0.7978846, %v214_v33  ;;  %v222_v41 = vmul.f32 0.5, %v214_v33 }
 0x1de   :  { %v219_v36 = vmul.f32 %v217_v35, %v214_v33 }
 0x1e0   :  { %v220_v38 = vmul.f32 0.035677407, %v219_v36 }
 0x1e2   :  { %v221_v39 = vadd.f32 %v220_v38, %v218_v37 }
 0x1e4   :  { %397 = vtanh.f32 %v221_v39 }
 0x1ee   :  { %v398_v40 = vpop.eup %397 }
 0x1ef   :  { %v224_v42 = vadd.f32 1.0, %v398_v40 }
 0x1f1   :  { %v225_v43 = vmul.f32 %v224_v42, %v222_v41 }
 0x1f3   :  { %373 = vmatmul.mubr.msk.f32.vlgmr.msra.gmra.mrb[2].mxu0 %vm143_vm2, %v225_v43 }
 0x2c6   :  { %v306_v45 = vpop.f32.mrb[2].mxu0 }
 0x2c7   :  { %v307_v46 = vadd.f32 %v331_v44, %v306_v45  ;;  %v374_v47 = vpop.f32.mrb[3].mxu0 }
 0x2c9   :  { %311 = vst.msk [vmem:[#allocation5] sm:$0xff] %vm310_vm3, %v307_v46 }
 0x2ca   :  { %432 = shalt.err (!%p429_p12)
}
 0x2cb   :  { %s433_s15 = scalar_lea.hbm %s564_s7, 128 }
 0x2cc   :  { %p434_p13 = scmp.ne.s32.totalorder %s564_s7, %s433_s15  ;;  %p437_p0 = scmp.lt.u32.totalorder %s433_s15, %s564_s7 }
 0x2ce   :  { %p439_p1 = pnand %p437_p0, %p434_p13 }
 0x2d0   :  { %442 = shalt.err (!%p439_p1)
}
 0x2d1   :  { %321 = dma.vmem_to_hbm [thread:$0]  %s319_s11, 128, %s564_s7, [#allocation4]  }
 0x2d2   :  { %445 = dma.done.wait [#allocation4], 128  }
 0x2d3   :  { %446 = vsyncadd [#allocation4], 4294967168 }
 0x2d4   :  { %325 = vsyncpa [#allocation3], 1 }
 0x2d5   :  { %326 = vsyncpa [#allocation4], 1 }

</bundles_post_ra>
